<compile_context>
chip_gen: v7x
topology: tpu7x:2x2x1
jax: 0.10.0
libtpu: 0.0.40
codegen_flags: <defaults>
</compile_context>

<pallas_src>
import jax
import jax.numpy as jnp
import numpy as np
from jax.experimental import pallas as pl
from jax.experimental.pallas import tpu as pltpu


def _st2d_kernel(grid_ref, src_ref, flow_ref, out_ref):
    # grid_ref: (2,   TP)    f32   base pixel coords (row 0 = x/col, row 1 = y/row)
    # src_ref : (1, C*H, W)  f32   resident for the whole batch element
    # flow_ref: (1, 2,  TP)  f32   lane-dense pixel tile of the displacement field
    # out_ref : (1, C,  TP)  f32   lane-dense output tile
    _, CH, W = src_ref.shape
    _, C, TP = out_ref.shape
    H = CH // C

    gx = grid_ref[0:1, :]                                        # (1, TP)
    gy = grid_ref[1:2, :]                                        # (1, TP)
    fx = flow_ref[0, 0:1, :]                                     # (1, TP) x-displacement
    fy = flow_ref[0, 1:2, :]                                     # (1, TP) y-displacement

    # Keep the exact PyTorch arithmetic chain (normalize, then grid_sample's
    # align_corners=True un-normalize); it is only a few ops on (1, TP) vectors.
    nx = (gx + fx) / ((W - 1) / 2.0) - 1.0
    ny = (gy + fy) / ((H - 1) / 2.0) - 1.0
    ix = (nx + 1.0) * (0.5 * (W - 1))                            # (1, TP) sample x (pixels)
    iy = (ny + 1.0) * (0.5 * (H - 1))                            # (1, TP) sample y (pixels)

    # Tent-function bilinear selectors: weight wx0 at floor(ix), wx1 at floor(ix)+1,
    # zero everywhere else; out-of-range samples match nothing => zeros padding.
    col_w = jax.lax.broadcasted_iota(jnp.int32, (W, 1), 0).astype(jnp.float32)
    sel_x = jnp.maximum(0.0, 1.0 - jnp.abs(col_w - ix))          # (W, TP)
    row_h = jax.lax.broadcasted_iota(jnp.int32, (H, 1), 0).astype(jnp.float32)
    sel_y = jnp.maximum(0.0, 1.0 - jnp.abs(row_h - iy))          # (H, TP)

    # x gather + x interpolation on the MXU: (C*H, W) @ (W, TP) -> (C*H, TP).
    rows = jnp.dot(src_ref[0], sel_x, preferred_element_type=jnp.float32)

    # y interpolation + per-channel row sum, fully in f32 on the VPU/XLU:
    # (C, H, TP) * (1, H, TP) summed over H -> (C, TP), lane-dense.
    out = jnp.sum(rows.reshape(C, H, TP) * sel_y[None, :, :], axis=1)
    out_ref[0, :, :] = out


def _choose_pixel_tile(P, max_tp=1024):
    """Largest multiple of 128 <= max_tp that divides P; else the full extent."""
    if P <= max_tp or P % 128 != 0:
        return P
    tp = (max_tp // 128) * 128
    while tp >= 128:
        if P % tp == 0:
            return tp
        tp -= 128
    return P


def spatial_transformer_2d(src, flow, *, max_pixel_tile=1024):
    """Pallas equivalent of SpatialTransformer((H, W), mode='bilinear')(src, flow)."""
    # TODO(synk): only the 2-D bilinear path is implemented (mode='nearest' and the
    # 3-D / trilinear variant of the module are not).
    # TODO(synk): for very large W (>= ~512), replace the one-hot MXU gather with a
    # scalar-prefetch / DMA row gather to drop the O(H*W * W) matmul term.
    src = jnp.asarray(src, jnp.float32)     # kernel assumes f32 tiles/promotion
    flow = jnp.asarray(flow, jnp.float32)
    B, C, H, W = src.shape
    assert flow.shape == (B, 2, H, W)
    assert H > 1 and W > 1, "degenerate spatial size divides by zero in normalization"
    P = H * W
    TP = _choose_pixel_tile(P, max_pixel_tile)

    # Pure reshapes of the NCHW inputs -- no wrapper transposes / extra HBM passes.
    src_r = src.reshape(B, C * H, W)
    flow_r = flow.reshape(B, 2, P)

    # Grid-invariant base pixel coordinates, built once on the host.
    pidx = np.arange(P, dtype=np.int64)
    base_grid = jnp.asarray(
        np.stack([pidx % W, pidx // W]).astype(np.float32))       # (2, P)

    out_cp = pl.pallas_call(
        _st2d_kernel,
        out_shape=jax.ShapeDtypeStruct((B, C, P), jnp.float32),
        grid=(B, P // TP),
        in_specs=[
            pl.BlockSpec((2, TP), lambda b, j: (0, j)),            # base grid tile
            pl.BlockSpec((1, C * H, W), lambda b, j: (b, 0, 0)),   # src resident per batch
            pl.BlockSpec((1, 2, TP), lambda b, j: (b, 0, j)),      # lane-dense flow tile
        ],
        out_specs=pl.BlockSpec((1, C, TP), lambda b, j: (b, 0, j)),  # lane-dense output
        compiler_params=pltpu.CompilerParams(
            dimension_semantics=("parallel", "parallel"),
            # 48 MiB: above the scoped defaults on v5e/v6e/v7x, below the v7x 64 MiB
            # physical ceiling.
            vmem_limit_bytes=48 * 1024 * 1024,
        ),
    )(base_grid, src_r, flow_r)

    return out_cp.reshape(B, C, H, W)


def _reference_spatial_transformer_2d(src, flow):
    """Pure-JAX reference matching torch grid_sample(align_corners=True, zeros)."""
    B, C, H, W = src.shape
    gy, gx = jnp.meshgrid(jnp.arange(H, dtype=jnp.float32),
                          jnp.arange(W, dtype=jnp.float32), indexing="ij")
    nx = (gx[None] + flow[:, 0]) / ((W - 1) / 2.0) - 1.0
    ny = (gy[None] + flow[:, 1]) / ((H - 1) / 2.0) - 1.0
    ix = (nx + 1.0) * 0.5 * (W - 1)
    iy = (ny + 1.0) * 0.5 * (H - 1)
    x0 = jnp.floor(ix); x1 = x0 + 1.0
    y0 = jnp.floor(iy); y1 = y0 + 1.0
    wx1 = ix - x0; wx0 = 1.0 - wx1
    wy1 = iy - y0; wy0 = 1.0 - wy1

    def corner(yc, xc):
        valid = (xc >= 0) & (xc <= W - 1) & (yc >= 0) & (yc <= H - 1)
        xi = jnp.clip(xc, 0, W - 1).astype(jnp.int32)
        yi = jnp.clip(yc, 0, H - 1).astype(jnp.int32)

        def one(src_b, yi_b, xi_b, valid_b):
            return src_b[:, yi_b, xi_b] * valid_b[None].astype(src_b.dtype)

        return jax.vmap(one)(src, yi, xi, valid)

    v00 = corner(y0, x0); v01 = corner(y0, x1)
    v10 = corner(y1, x0); v11 = corner(y1, x1)
    w00 = (wy0 * wx0)[:, None]; w01 = (wy0 * wx1)[:, None]
    w10 = (wy1 * wx0)[:, None]; w11 = (wy1 * wx1)[:, None]
    return w00 * v00 + w01 * v01 + w10 * v10 + w11 * v11


if __name__ == "__main__":
    key = jax.random.PRNGKey(0)
    k_src, k_flow = jax.random.split(key)
    B, C, H, W = 2, 4, 16, 16
    src = jax.random.normal(k_src, (B, C, H, W), dtype=jnp.float32)
    flow = jax.random.normal(k_flow, (B, 2, H, W), dtype=jnp.float32) * 3.0

    out = spatial_transformer_2d(src, flow)
    out = jax.block_until_ready(out)

    ref = _reference_spatial_transformer_2d(src, flow)
    assert out.shape == (B, C, H, W)
    # DEFAULT MXU precision rounds src / x-weights to bf16 inside the gather matmul
    # (~4e-3 relative); keep the tolerance comfortably above that.
    np.testing.assert_allclose(np.asarray(out), np.asarray(ref), rtol=3e-2, atol=3e-2)
    print("KERNEL_OK")
</pallas_src>

<mosaic_0001>
module attributes {stable_mosaic.version = 11 : i64} {
  func.func @_st2d_kernel(%arg0: i32, %arg1: i32, %arg2: memref<2x256xf32, #tpu.memory_space<vmem>>, %arg3: memref<1x64x16xf32, #tpu.memory_space<vmem>>, %arg4: memref<1x2x256xf32, #tpu.memory_space<vmem>>, %arg5: memref<1x4x256xf32, #tpu.memory_space<vmem>>) attributes {dimension_semantics = [#tpu.dimension_semantics<parallel>, #tpu.dimension_semantics<parallel>], iteration_bounds = array<i64: 2, 1>, scalar_prefetch = 0 : i64, scratch_operands = 0 : i64, tpu.core_type = #tpu.core_type<tc>, window_params = [{transform_indices = @transform_0, window_bounds = array<i64: 2, 256>}, {transform_indices = @transform_1, window_bounds = array<i64: 1, 64, 16>}, {transform_indices = @transform_2, window_bounds = array<i64: 1, 2, 256>}, {transform_indices = @transform_3, window_bounds = array<i64: 1, 4, 256>}]} {
    %c0 = arith.constant 0 : index
    %c0_0 = arith.constant 0 : index
    %0 = vector.load %arg2[%c0, %c0_0] : memref<2x256xf32, #tpu.memory_space<vmem>>, vector<1x256xf32>
    %c1 = arith.constant 1 : index
    %c0_1 = arith.constant 0 : index
    %1 = vector.load %arg2[%c1, %c0_1] : memref<2x256xf32, #tpu.memory_space<vmem>>, vector<1x256xf32>
    %c0_2 = arith.constant 0 : index
    %c0_3 = arith.constant 0 : index
    %c0_4 = arith.constant 0 : index
    %2 = vector.load %arg4[%c0_2, %c0_3, %c0_4] : memref<1x2x256xf32, #tpu.memory_space<vmem>>, vector<1x1x256xf32>
    %3 = vector.shape_cast %2 : vector<1x1x256xf32> to vector<1x256xf32>
    %c0_5 = arith.constant 0 : index
    %c1_6 = arith.constant 1 : index
    %c0_7 = arith.constant 0 : index
    %4 = vector.load %arg4[%c0_5, %c1_6, %c0_7] : memref<1x2x256xf32, #tpu.memory_space<vmem>>, vector<1x1x256xf32>
    %5 = vector.shape_cast %4 : vector<1x1x256xf32> to vector<1x256xf32>
    %6 = arith.addf %0, %3 : vector<1x256xf32>
    %cst = arith.constant 7.500000e+00 : f32
    %7 = vector.broadcast %cst : f32 to vector<1x256xf32>
    %8 = arith.divf %6, %7 : vector<1x256xf32>
    %cst_8 = arith.constant 1.000000e+00 : f32
    %9 = vector.broadcast %cst_8 : f32 to vector<1x256xf32>
    %10 = arith.subf %8, %9 : vector<1x256xf32>
    %11 = arith.addf %1, %5 : vector<1x256xf32>
    %cst_9 = arith.constant 7.500000e+00 : f32
    %12 = vector.broadcast %cst_9 : f32 to vector<1x256xf32>
    %13 = arith.divf %11, %12 : vector<1x256xf32>
    %cst_10 = arith.constant 1.000000e+00 : f32
    %14 = vector.broadcast %cst_10 : f32 to vector<1x256xf32>
    %15 = arith.subf %13, %14 : vector<1x256xf32>
    %cst_11 = arith.constant 1.000000e+00 : f32
    %16 = vector.broadcast %cst_11 : f32 to vector<1x256xf32>
    %17 = arith.addf %10, %16 : vector<1x256xf32>
    %cst_12 = arith.constant 7.500000e+00 : f32
    %18 = vector.broadcast %cst_12 : f32 to vector<1x256xf32>
    %19 = arith.mulf %17, %18 : vector<1x256xf32>
    %cst_13 = arith.constant 1.000000e+00 : f32
    %20 = vector.broadcast %cst_13 : f32 to vector<1x256xf32>
    %21 = arith.addf %15, %20 : vector<1x256xf32>
    %cst_14 = arith.constant 7.500000e+00 : f32
    %22 = vector.broadcast %cst_14 : f32 to vector<1x256xf32>
    %23 = arith.mulf %21, %22 : vector<1x256xf32>
    %24 = tpu.iota {dimensions = array<i32: 0>} : vector<16x1xi32>
    %25 = arith.sitofp %24 : vector<16x1xi32> to vector<16x1xf32>
    %26 = vector.broadcast %25 : vector<16x1xf32> to vector<16x256xf32>
    %27 = vector.broadcast %19 : vector<1x256xf32> to vector<16x256xf32>
    %28 = arith.subf %26, %27 : vector<16x256xf32>
    %29 = math.absf %28 : vector<16x256xf32>
    %cst_15 = arith.constant 1.000000e+00 : f32
    %30 = vector.broadcast %cst_15 : f32 to vector<16x256xf32>
    %31 = arith.subf %30, %29 : vector<16x256xf32>
    %cst_16 = arith.constant 0.000000e+00 : f32
    %32 = vector.broadcast %cst_16 : f32 to vector<16x256xf32>
    %33 = arith.maximumf %32, %31 : vector<16x256xf32>
    %34 = tpu.iota {dimensions = array<i32: 0>} : vector<16x1xi32>
    %35 = arith.sitofp %34 : vector<16x1xi32> to vector<16x1xf32>
    %36 = vector.broadcast %35 : vector<16x1xf32> to vector<16x256xf32>
    %37 = vector.broadcast %23 : vector<1x256xf32> to vector<16x256xf32>
    %38 = arith.subf %36, %37 : vector<16x256xf32>
    %39 = math.absf %38 : vector<16x256xf32>
    %cst_17 = arith.constant 1.000000e+00 : f32
    %40 = vector.broadcast %cst_17 : f32 to vector<16x256xf32>
    %41 = arith.subf %40, %39 : vector<16x256xf32>
    %cst_18 = arith.constant 0.000000e+00 : f32
    %42 = vector.broadcast %cst_18 : f32 to vector<16x256xf32>
    %43 = arith.maximumf %42, %41 : vector<16x256xf32>
    %c0_19 = arith.constant 0 : index
    %c0_20 = arith.constant 0 : index
    %c0_21 = arith.constant 0 : index
    %44 = vector.load %arg3[%c0_19, %c0_20, %c0_21] : memref<1x64x16xf32, #tpu.memory_space<vmem>>, vector<1x64x16xf32>
    %45 = vector.shape_cast %44 : vector<1x64x16xf32> to vector<64x16xf32>
    %cst_22 = arith.constant dense<0.000000e+00> : vector<64x256xf32>
    %46 = tpu.matmul %45, %33, %cst_22 {dimension_numbers = #tpu.dot_dimension_numbers<[1], [0], [0], [1], [0, 0, 1, 1], [], []>} : vector<64x16xf32>, vector<16x256xf32>, vector<64x256xf32> -> vector<64x256xf32>
    %47 = vector.shape_cast %46 : vector<64x256xf32> to vector<4x16x256xf32>
    %48 = vector.shape_cast %43 : vector<16x256xf32> to vector<1x16x256xf32>
    %49 = vector.broadcast %48 : vector<1x16x256xf32> to vector<4x16x256xf32>
    %50 = arith.mulf %47, %49 : vector<4x16x256xf32>
    %cst_23 = arith.constant dense<0.000000e+00> : vector<4x256xf32>
    %51 = vector.multi_reduction <add>, %50, %cst_23 [1] : vector<4x16x256xf32> to vector<4x256xf32>
    %c0_24 = arith.constant 0 : index
    %c0_25 = arith.constant 0 : index
    %c0_26 = arith.constant 0 : index
    %52 = vector.load %arg5[%c0_24, %c0_25, %c0_26] : memref<1x4x256xf32, #tpu.memory_space<vmem>>, vector<1x4x256xf32>
    %53 = vector.shape_cast %52 : vector<1x4x256xf32> to vector<4x256xf32>
    %54 = vector.shape_cast %51 : vector<4x256xf32> to vector<1x4x256xf32>
    tpu.vector_store %arg5[%c0_24, %c0_25, %c0_26], %54 {strides = array<i32>} : memref<1x4x256xf32, #tpu.memory_space<vmem>>, vector<1x4x256xf32>,
    return
  }
  func.func @transform_0(%arg0: i32, %arg1: i32) -> (i32, i32) {
    %c0_i32 = arith.constant 0 : i32
    %c0_i32_0 = arith.constant 0 : i32
    return %c0_i32, %arg1 : i32, i32
  }
  func.func @transform_1(%arg0: i32, %arg1: i32) -> (i32, i32, i32) {
    %c0_i32 = arith.constant 0 : i32
    %c0_i32_0 = arith.constant 0 : i32
    %c0_i32_1 = arith.constant 0 : i32
    return %arg0, %c0_i32, %c0_i32_0 : i32, i32, i32
  }
  func.func @transform_2(%arg0: i32, %arg1: i32) -> (i32, i32, i32) {
    %c0_i32 = arith.constant 0 : i32
    %c0_i32_0 = arith.constant 0 : i32
    return %arg0, %c0_i32, %arg1 : i32, i32, i32
  }
  func.func @transform_3(%arg0: i32, %arg1: i32) -> (i32, i32, i32) {
    %c0_i32 = arith.constant 0 : i32
    %c0_i32_0 = arith.constant 0 : i32
    return %arg0, %c0_i32, %arg1 : i32, i32, i32
  }
}

</mosaic_0001>

<bundles_post_ra>
// kernel: tpu_custom_call.1
= control target key start
LH: loop header
LB: loop body
LE: loop exit
PB: predicated region body
PF: predicated region fallthrough
CT: control target
= control target key end

     0   :  { %8 = vsyncpa [#allocation3], 0  ;;  %s1021_s0 = inlined_call_operand.vmem [shape: f32[2,256], index: 0, kind: input, shape index: {}]   ;;  %s1022_s1 = inlined_call_operand.vmem [shape: f32[2,64,16], index: 1, kind: input, shape index: {}]   ;;  %s1023_s2 = inlined_call_operand.vmem [shape: f32[2,2,256], index: 2, kind: input, shape index: {}]   ;;  %s1024_s3 = inlined_call_operand.hbm [shape: f32[2,4,256], index: 3, kind: output, shape index: {}]  }
   0x1   :  { %10 = vsyncpa [#allocation3 + $0x1], 0  ;;  %s880_s12 = smov 0   ;;  %s882_s13 = smov 0  }
   0x2   :  { %s884_s14 = smov 0   ;;  %s886_s15 = smov 0  }
   0x3   :  { %s888_s16 = smov 0   ;;  %s890_s17 = smov 0  }
   0x4 LB: > { %s685_s18 = sadd.s32 4294967295, %s856_s17   ;;  %s686_s19 = sadd.s32 4294967294, %s856_s17   ;;  %s856_s17 = sphi %s890_s17, %s16_s17   ;;  %s852_s16 = sphi %s888_s16, %s1031_s16   ;;  %s848_s15 = sphi %s886_s15, %s1030_s15   ;;  %s844_s14 = sphi %s884_s14, %s1029_s14   ;;  %s840_s13 = sphi %s882_s13, %s1028_s13   ;;  %s836_s12 = sphi %s880_s12, %s1027_s12  }
   0x5   : > { %s28_s20 = sadd.s32 1, %s852_s16  ;;  %s117_s21 = sadd.s32 1, %s844_s14 }
   0x6   : > { %p30_p0 = scmp.ge.s32.totalorder %s28_s20, 2  ;;  %p127_p1 = scmp.ne.s32.totalorder %s844_s14, %s840_s13 }
   0x7   : > { %p128_p2 = scmp.eq.s32.totalorder %s685_s18, 1  ;;  %p133_p3 = scmp.ne.s32.totalorder %s840_s13, %s836_s12 }
   0x8   : > { %s1033_s20 = smov (%p30_p0, %s28_s20), 0  ;;  %p134_p5 = scmp.eq.s32.totalorder %s686_s19, 1 }
   0x9   : > { %p920_p4 = por %p128_p2, %p127_p1  ;;  %s112_s23 = ssub.s32 %s852_s16, %s1033_s20 }
   0xa   : > { %p690_p6 = scmp.ge.s32.totalorder %s856_s17, 1  ;;  %p115_p7 = scmp.eq.s32.totalorder %s112_s23, 0 }
   0xb   : > { %p927_p8 = por %p134_p5, %p133_p3  ;;  %p182_p9 = scmp.lt.s32.totalorder %s856_s17, 3 }
   0xc   : > { %s933_s25 = scalar_select %p115_p7, %s844_s14, %s117_s21  }
   0xd   : > { %p183_p10 = pnand %p690_p6, %p182_p9 }
   0xe   : > { %p226_p11 = scmp.lt.s32.totalorder (!%p183_p10), %s848_s15, 1  ;;  %v858_v0 = vmov (!%p183_p10), 0.0   ;;  %v242_v1 = vld [vmem:[%s1021_s0] ss:$2 sm:$0x3] (!%p183_p10)  ;;  %v259_v2 = vlaneseq (!%p183_p10)  ;;  %vm326_vm0 = vcmask (!%p183_p10), 130048  }
   0xf   : > { %186 = sbr.rel (%p183_p10) target bundleno = 318 (0x13e), region = 32  ;;  %415 = vmatprep.mubr.f32.mxu0 (!%p183_p10), %v858_v0  ;;  %439 = vmatprep.mubr.f32.mxu1 (!%p183_p10), %v858_v0  ;;  %v696_v3 = vld [vmem:[%s1021_s0 + $0x1] ss:$2 sm:$0x3] (!%p183_p10)  ;;  %s217_s18 = sand.u32 (!%p183_p10), 1, %s840_s13   ;;  %vm549_vm1 = vcmask (!%p183_p10), 1041409  }
  0x10   : > { %v260_v8 = vshrl.u32 (!%p183_p10), %v259_v2, 7  ;;  %s691_s19 = sshll.u32 (!%p183_p10), %s217_s18, 3  ;;  %vm551_vm2 = vcmask (!%p183_p10), 1045509   ;;  %vm554_vm3 = vcmask (!%p183_p10), 1042434   ;;  %vm556_vm4 = vcmask (!%p183_p10), 1046534   ;;  %s715_s21 = sshll.u32 (!%p183_p10), %s848_s15, 7 }
  0x11   : > { %vm559_vm5 = vcmask (!%p183_p10), 1043459   ;;  %s219_s23 = scalar_lea.vmem (!%p183_p10), [#allocation2], %s691_s19  ;;  %vm561_vm6 = vcmask (!%p183_p10), 1047559   ;;  %s859_s4 = smov (!%p183_p10), [#allocation2]  }
  0x12   : > { %v261_v13 = vadd.s32 (!%p183_p10), 8, %v260_v8  ;;  %v271_v16 = vsub.s32 (!%p183_p10), 1, %v260_v8  ;;  %v267_v17 = vsub.s32 (!%p183_p10), 0, %v260_v8  ;;  %v262_v20 = vcvt.s32.f32 (!%p183_p10), %v260_v8  ;;  %s782_s5 = sshll.u32 (!%p183_p10), %s859_s4, 4  ;;  %s783_s5 = int_to_ptr.vmem [resolvable:$false] %s782_s5 }
  0x13   : > { %s784_s6 = scalar_lea.vmem (!%p183_p10), %s783_s5, 256 }
  0x14   : > { %v263_v21 = vcvt.s32.f32 (!%p183_p10), %v261_v13 }
  0x16   : > { %s939_s26 = scalar_select %p226_p11, %s848_s15, 1 }
  0x17   : > { %s566_s15 = scalar_lea.sflag [#allocation3], %s217_s18 }
  0x18   : > { %s714_s29 = sshll.u32 %s939_s26, 2  ;;  %s713_s8 = sshll.u32 %s939_s26, 6 }
  0x19   : > { %s239_s7 = scalar_lea.vmem %s1023_s2, %s714_s29  ;;  %s230_s11 = scalar_lea.vmem %s1022_s1, %s713_s8 }
  0x1a   : > { %v245_v4 = vld [vmem:[%s239_s7] ss:$2 sm:$0x3]  ;;  %v697_v5 = vld [vmem:[%s239_s7 + $0x1] ss:$2 sm:$0x3]  ;;  %s974_s29 = scalar_lea.hbm %s1024_s3, %s715_s21 }
  0x1b   : > { %v248_v6 = vadd.f32 %v245_v4, %v242_v1  ;;  %v252_v7 = vadd.f32 %v697_v5, %v696_v3  ;;  %v318_v44 = vld [vmem:[%s230_s11] sm:$0xff]  ;;  %v319_v46 = vld [vmem:[%s230_s11 + $0x8] sm:$0xff]  ;;  %v320_v48 = vld [vmem:[%s230_s11 + $0x10] sm:$0xff]  ;;  %s582_s26 = sshll.u32 %s219_s23, 4  ;;  %s976_s26 = int_to_ptr.vmem [resolvable:$true] %s582_s26 }
  0x1c   : > { %v322_v45 = vld [vmem:[%s230_s11 + $0x20] sm:$0xff]  ;;  %v323_v47 = vld [vmem:[%s230_s11 + $0x28] sm:$0xff]  ;;  %v324_v49 = vld [vmem:[%s230_s11 + $0x30] sm:$0xff]  ;;  %s778_s30 = scalar_lea.vmem %s976_s26, 128  ;;  %p785_p1 = scmp.lt.s32.totalorder %s976_s26, %s783_s5 }
  0x1d   : > { %v250_v9 = vmul.f32 0.13333334, %v248_v6  ;;  %v253_v10 = vmul.f32 0.13333334, %v252_v7  ;;  %v321_v50 = vld [vmem:[%s230_s11 + $0x18] sm:$0xff]  ;;  %p779_p12 = scmp.ne.s32.totalorder %s976_s26, %s778_s30  ;;  %p786_p2 = scmp.lt.s32.totalorder %s784_s6, %s778_s30 }
  0x1e   : > { %v325_v51 = vld [vmem:[%s230_s11 + $0x38] sm:$0xff] }
  0x1f   : > { %v698_v11 = vadd.f32 -1.0, %v250_v9  ;;  %v699_v12 = vadd.f32 -1.0, %v253_v10  ;;  %p780_p13 = pnand %p779_p12, %p920_p4  ;;  %p787_p3 = por %p786_p2, %p785_p1 }
  0x21   : > { %v255_v14 = vadd.f32 1.0, %v698_v11  ;;  %v257_v15 = vadd.f32 1.0, %v699_v12  ;;  %p781_p0 = pneg %p780_p13 }
  0x23   : > { %v256_v18 = vmul.f32 7.5, %v255_v14  ;;  %v258_v19 = vmul.f32 7.5, %v257_v15  ;;  %p788_p5 = pnand %p787_p3, %p781_p0 }
  0x25   : > { %v272_v22 = vrot.slane %v256_v18, %v271_v16  ;;  %v299_v23 = vrot.slane %v258_v19, %v271_v16  ;;  %v268_v24 = vrot.slane %v256_v18, %v267_v17  ;;  %v295_v25 = vrot.slane %v258_v19, %v267_v17 }
  0x27   : > { %v276_v26 = vsub.f32 %v262_v20, %v272_v22  ;;  %v278_v27 = vsub.f32 %v263_v21, %v272_v22  ;;  %v275_v28 = vsub.f32 %v262_v20, %v268_v24  ;;  %v277_v29 = vsub.f32 %v263_v21, %v268_v24 }
  0x28   : > { %v302_v52 = vsub.f32 %v262_v20, %v295_v25  ;;  %v303_v53 = vsub.f32 %v262_v20, %v299_v23  ;;  %v304_v55 = vsub.f32 %v263_v21, %v295_v25  ;;  %v305_v57 = vsub.f32 %v263_v21, %v299_v23 }
  0x29   : > { %v280_v30 = vand.u32 2147483647, %v276_v26  ;;  %v282_v31 = vand.u32 2147483647, %v278_v27  ;;  %v279_v32 = vand.u32 2147483647, %v275_v28 }
  0x2a   : > { %v281_v33 = vand.u32 2147483647, %v277_v29  ;;  %v306_v54 = vand.u32 2147483647, %v302_v52  ;;  %v307_v56 = vand.u32 2147483647, %v303_v53 }
  0x2b   : > { %v284_v34 = vsub.f32 1.0, %v280_v30  ;;  %v286_v35 = vsub.f32 1.0, %v282_v31  ;;  %v283_v36 = vsub.f32 1.0, %v279_v32  ;;  %v308_v59 = vand.u32 2147483647, %v304_v55 }
  0x2c   : > { %v285_v37 = vsub.f32 1.0, %v281_v33  ;;  %v310_v58 = vsub.f32 1.0, %v306_v54  ;;  %v311_v60 = vsub.f32 1.0, %v307_v56  ;;  %v309_v61 = vand.u32 2147483647, %v305_v57 }
  0x2d   : > { %v288_v38 = vmax.f32 %v284_v34, 0.0  ;;  %v290_v39 = vmax.f32 %v286_v35, 0.0  ;;  %v287_v40 = vmax.f32 %v283_v36, 0.0  ;;  %v312_v63 = vsub.f32 1.0, %v308_v59 }
  0x2e   : > { %v289_v41 = vmax.f32 %v285_v37, 0.0  ;;  %v314_v62 = vmax.f32 %v310_v58, 0.0  ;;  %v315_v1 = vmax.f32 %v311_v60, 0.0 }
  0x2f   : > { %v716_v42 = vpack.c.bf16 %v290_v39, %v288_v38  ;;  %v316_v8 = vmax.f32 %v312_v63, 0.0 }
  0x30   : > { %v718_v43 = vpack.c.bf16 %v289_v41, %v287_v40 }
  0x31   : > { %717 = vmatprep.subr.bf16.mxu0 %v716_v42  ;;  %720 = vmatprep.subr.bf16.mxu1 %v716_v42 }
  0x32   : > { %719 = vmatpush1.bf16.msra.mxu0 %v718_v43  ;;  %721 = vmatpush1.bf16.msra.mxu1 %v718_v43 }
  0x35   : > { %700 = vmatmul.mubr.msk.f32.vlgmr.msra.gmra.mrb[0].mxu0 %vm326_vm0, %v318_v44  ;;  %704 = vmatmul.mubr.msk.f32.vlgmr.msra.gmra.mrb[0].mxu1 %vm326_vm0, %v322_v45 }
  0x36   : > { %421 = vmatprep.mubr.f32.mxu0 %v858_v0  ;;  %445 = vmatprep.mubr.f32.mxu1 %v858_v0 }
  0x39   : > { %701 = vmatmul.mubr.msk.f32.gmra.mrb[2].mxu0 %vm326_vm0, %v319_v46  ;;  %705 = vmatmul.mubr.msk.f32.gmra.mrb[2].mxu1 %vm326_vm0, %v323_v47 }
  0x3a   : > { %427 = vmatprep.mubr.f32.mxu0 %v858_v0  ;;  %451 = vmatprep.mubr.f32.mxu1 %v858_v0 }
  0x3d   : > { %702 = vmatmul.mubr.msk.f32.gmra.mrb[4].mxu0 %vm326_vm0, %v320_v48  ;;  %706 = vmatmul.mubr.msk.f32.gmra.mrb[4].mxu1 %vm326_vm0, %v324_v49 }
  0x3e   : > { %433 = vmatprep.mubr.f32.mxu0 %v858_v0  ;;  %457 = vmatprep.mubr.f32.mxu1 %v858_v0  ;;  %v313_v0 = vsub.f32 1.0, %v309_v61 }
  0x40   : > { %v317_v11 = vmax.f32 %v313_v0, 0.0 }
  0x41   : > { %703 = vmatmul.mubr.msk.f32.gmra.mrb[6].mxu0 %vm326_vm0, %v321_v50  ;;  %707 = vmatmul.mubr.msk.f32.gmra.mrb[6].mxu1 %vm326_vm0, %v325_v51 }
 0x108   : > { %v417_v2 = vpop.f32.mrb[0].mxu0  ;;  %v441_v3 = vpop.f32.mrb[0].mxu1 }
 0x109   : > { %v464_v4 = vmul.f32 %v417_v2, %v314_v62  ;;  %v419_v5 = vpop.f32.mrb[1].mxu0  ;;  %v472_v6 = vmul.f32 %v441_v3, %v314_v62  ;;  %v443_v7 = vpop.f32.mrb[1].mxu1 }
 0x10a   : > { %v465_v9 = vmul.f32 %v419_v5, %v315_v1  ;;  %v473_v10 = vmul.f32 %v443_v7, %v315_v1 }
 0x10c   : > { %v423_v12 = vpop.f32.mrb[2].mxu0  ;;  %v447_v13 = vpop.f32.mrb[2].mxu1 }
 0x10d   : > { %v466_v14 = vmul.f32 %v423_v12, %v316_v8  ;;  %v474_v15 = vmul.f32 %v447_v13, %v316_v8  ;;  %v425_v16 = vpop.f32.mrb[3].mxu0  ;;  %v449_v17 = vpop.f32.mrb[3].mxu1 }
 0x10e   : > { %v467_v18 = vmul.f32 %v425_v16, %v317_v11  ;;  %v475_v19 = vmul.f32 %v449_v17, %v317_v11 }
 0x10f   : > { %v480_v20 = vadd.f32 %v466_v14, %v464_v4  ;;  %v508_v21 = vadd.f32 %v474_v15, %v472_v6 }
 0x110   : > { %v487_v22 = vadd.f32 %v467_v18, %v465_v9  ;;  %v515_v23 = vadd.f32 %v475_v19, %v473_v10  ;;  %v429_v24 = vpop.f32.mrb[4].mxu0  ;;  %v453_v25 = vpop.f32.mrb[4].mxu1 }
 0x111   : > { %v481_v26 = vrot.slane %v480_v20, 4  ;;  %v509_v27 = vrot.slane %v508_v21, 4  ;;  %v468_v28 = vmul.f32 %v429_v24, %v314_v62  ;;  %v431_v29 = vpop.f32.mrb[5].mxu0  ;;  %v476_v30 = vmul.f32 %v453_v25, %v314_v62  ;;  %v455_v31 = vpop.f32.mrb[5].mxu1 }
 0x112   : > { %v488_v32 = vrot.slane %v487_v22, 4  ;;  %v516_v33 = vrot.slane %v515_v23, 4  ;;  %v469_v34 = vmul.f32 %v431_v29, %v315_v1  ;;  %v477_v35 = vmul.f32 %v455_v31, %v315_v1 }
 0x113   : > { %v482_v36 = vadd.f32 %v481_v26, %v480_v20  ;;  %v510_v37 = vadd.f32 %v509_v27, %v508_v21 }
 0x114   : > { %v489_v38 = vadd.f32 %v488_v32, %v487_v22  ;;  %v517_v39 = vadd.f32 %v516_v33, %v515_v23  ;;  %v435_v40 = vpop.f32.mrb[6].mxu0  ;;  %v459_v41 = vpop.f32.mrb[6].mxu1 }
 0x115   : > { %v483_v42 = vrot.slane %v482_v36, 2  ;;  %v511_v43 = vrot.slane %v510_v37, 2  ;;  %v470_v44 = vmul.f32 %v435_v40, %v316_v8  ;;  %v478_v45 = vmul.f32 %v459_v41, %v316_v8  ;;  %v437_v46 = vpop.f32.mrb[7].mxu0  ;;  %v461_v47 = vpop.f32.mrb[7].mxu1 }
 0x116   : > { %v490_v48 = vrot.slane %v489_v38, 2  ;;  %v518_v49 = vrot.slane %v517_v39, 2  ;;  %v471_v50 = vmul.f32 %v437_v46, %v317_v11  ;;  %v479_v51 = vmul.f32 %v461_v47, %v317_v11 }
 0x117   : > { %v484_v52 = vadd.f32 %v483_v42, %v482_v36  ;;  %v512_v53 = vadd.f32 %v511_v43, %v510_v37  ;;  %v494_v54 = vadd.f32 %v470_v44, %v468_v28  ;;  %v522_v55 = vadd.f32 %v478_v45, %v476_v30 }
 0x118   : > { %v491_v56 = vadd.f32 %v490_v48, %v489_v38  ;;  %v519_v57 = vadd.f32 %v518_v49, %v517_v39  ;;  %v501_v58 = vadd.f32 %v471_v50, %v469_v34  ;;  %v529_v59 = vadd.f32 %v479_v51, %v477_v35 }
 0x119   : > { %v485_v60 = vrot.slane %v484_v52, 1  ;;  %v513_v61 = vrot.slane %v512_v53, 1  ;;  %v495_v62 = vrot.slane %v494_v54, 4  ;;  %v523_v63 = vrot.slane %v522_v55, 4 }
 0x11a   : > { %v492_v1 = vrot.slane %v491_v56, 1  ;;  %v520_v0 = vrot.slane %v519_v57, 1  ;;  %v502_v2 = vrot.slane %v501_v58, 4  ;;  %v530_v3 = vrot.slane %v529_v59, 4 }
 0x11b   : > { %v486_v4 = vadd.f32 %v485_v60, %v484_v52  ;;  %v514_v5 = vadd.f32 %v513_v61, %v512_v53  ;;  %v496_v6 = vadd.f32 %v495_v62, %v494_v54  ;;  %v524_v7 = vadd.f32 %v523_v63, %v522_v55 }
 0x11c   : > { %v493_v8 = vadd.f32 %v492_v1, %v491_v56  ;;  %v521_v9 = vadd.f32 %v520_v0, %v519_v57  ;;  %v503_v10 = vadd.f32 %v502_v2, %v501_v58  ;;  %v531_v11 = vadd.f32 %v530_v3, %v529_v59 }
 0x11d   : > { %v497_v12 = vrot.slane %v496_v6, 2  ;;  %v525_v13 = vrot.slane %v524_v7, 2 }
 0x11e   : > { %v544_v14 = vcombine.low %v486_v4, %v493_v8  ;;  %v546_v15 = vcombine.low %v514_v5, %v521_v9  ;;  %v504_v16 = vrot.slane %v503_v10, 2  ;;  %v532_v17 = vrot.slane %v531_v11, 2 }
 0x11f   : > { %v498_v18 = vadd.f32 %v497_v12, %v496_v6  ;;  %v526_v19 = vadd.f32 %v525_v13, %v524_v7 }
 0x120   : > { %v505_v20 = vadd.f32 %v504_v16, %v503_v10  ;;  %v533_v21 = vadd.f32 %v532_v17, %v531_v11  ;;  %v553_v33 = vrot.slane %v546_v15, 6 }
 0x121   : > { %v499_v22 = vrot.slane %v498_v18, 1  ;;  %v527_v23 = vrot.slane %v526_v19, 1 }
 0x122   : > { %v506_v24 = vrot.slane %v505_v20, 1  ;;  %v534_v25 = vrot.slane %v533_v21, 1 }
 0x123   : > { %v500_v26 = vadd.f32 %v499_v22, %v498_v18  ;;  %v528_v27 = vadd.f32 %v527_v23, %v526_v19 }
 0x124   : > { %v507_v28 = vadd.f32 %v506_v24, %v505_v20  ;;  %v535_v29 = vadd.f32 %v534_v25, %v533_v21 }
 0x126   : > { %v545_v30 = vcombine.low %v500_v26, %v507_v28  ;;  %v547_v31 = vcombine.low %v528_v27, %v535_v29 }
 0x128   : > { %v548_v32 = vrot.slane %v545_v30, 7  ;;  %v558_v37 = vrot.slane %v547_v31, 5 }
 0x12a   : > { %v550_v34 = vsel %vm549_vm1, %v548_v32, %v544_v14 }
 0x12b   : > { %v552_v35 = vsel %vm551_vm2, %v548_v32, %v550_v34 }
 0x12c   : > { %v555_v36 = vsel %vm554_vm3, %v553_v33, %v552_v35 }
 0x12d   : > { %v557_v38 = vsel %vm556_vm4, %v553_v33, %v555_v36 }
 0x12e   : > { %v560_v39 = vsel %vm559_vm5, %v558_v37, %v557_v38 }
 0x12f   : > { %v562_v40 = vsel %vm561_vm6, %v558_v37, %v560_v39 }
 0x130   : > { %564 = vst [vmem:[%s219_s23] sm:$0xff] %v562_v40 }
 0x131   : > { %791 = shalt.err (!%p788_p5)
}
 0x132   : > { %s792_s7 = scalar_lea.hbm %s974_s29, 128  ;;  %s796_s10 = scalar_lea.hbm %s1024_s3, 256 }
 0x133   : > { %p793_p6 = scmp.ne.s32.totalorder %s974_s29, %s792_s7  ;;  %p797_p10 = scmp.lt.u32.totalorder %s974_s29, %s1024_s3 }
 0x134   : > { %p798_p11 = scmp.lt.u32.totalorder %s796_s10, %s792_s7  ;;  %p800_p13 = scmp.lt.u32.totalorder %s792_s7, %s974_s29 }
 0x135   : > { %p794_p7 = pnand %p793_p6, %p920_p4 }
 0x136   : > { %p799_p12 = por %p798_p11, %p797_p10 }
 0x137   : > { %p795_p9 = pneg %p794_p7 }
 0x138   : > { %p801_p0 = por %p800_p13, %p799_p12 }
 0x13a   : > { %p802_p1 = pnand %p801_p0, %p795_p9 }
 0x13c   : > { %805 = shalt.err (!%p802_p1)
}
 0x13d   : > { %722 = dma.vmem_to_hbm [thread:$0]  (%p920_p4), %s976_s26, 128, %s974_s29, %s566_s15  }
 0x13e PF: > { %p728_p2 = scmp.ge.s32.totalorder %s856_s17, 2  ;;  %s594_s19 = sand.u32 1, %s836_s12  }
 0x13f   : > { %s595_s21 = scalar_lea.sflag [#allocation3], %s594_s19 }
 0x140   : > { %p725_p3 = pnand %p728_p2, %p927_p8 }
 0x142   : > { %831 = dma.done.wait (!%p725_p3), %s595_s21, 128  }
 0x143   : > { %833 = vsyncadd (!%p725_p3), %s595_s21, 4294967168  ;;  %s16_s17 = sadd.s32 1, %s856_s17   ;;  %s1027_s12 = smov %s840_s13 }
 0x144   : > { %p13_p5 = scmp.ge.s32.totalorder %s16_s17, 4   ;;  %s1028_s13 = smov %s844_s14 }
 0x145   : > { %s1029_s14 = smov %s933_s25  ;;  %s1030_s15 = smov %s852_s16 }
 0x146   : > { %s1031_s16 = smov %s1033_s20  ;;  %15 = sbr.rel (!%p13_p5) target bundleno = 4 (0x4), region = 75 }
 0x14d   :  { %600 = vsyncpa [#allocation3], 1 }
 0x14e   :  { %602 = vsyncpa [#allocation3 + $0x1], 1 }

</bundles_post_ra>
